<compile_context>
chip_gen: v7x
topology: tpu7x:2x2x1
jax: 0.10.0
libtpu: 0.0.40
codegen_flags: <defaults>
</compile_context>

<pallas_src>
import jax
import jax.numpy as jnp
import numpy as np
from jax.experimental import pallas as pl
from jax.experimental.pallas import tpu as pltpu


def _round_up(x, m):
    return ((x + m - 1) // m) * m


def _critic_kernel(x_ref, w1_ref, b1_ref, w2_ref, b2_ref, w3_ref, b3_ref, o_ref):
    compute_dtype = w1_ref.dtype  # matmul operand dtype (f32 or bf16)
    x = x_ref[...]                # (TB, state_dim) tile

    # Layer 1: MXU matmul, f32 accumulation; bias + ReLU in f32 on the VPU,
    # then cast back so the next dot stays on the (bf16) MXU fast path.
    h1 = jnp.dot(x, w1_ref[...], preferred_element_type=jnp.float32) + b1_ref[...]
    h1 = jnp.maximum(h1, 0.0).astype(compute_dtype)

    # Layer 2: same structure.
    h2 = jnp.dot(h1, w2_ref[...], preferred_element_type=jnp.float32) + b2_ref[...]
    h2 = jnp.maximum(h2, 0.0).astype(compute_dtype)

    # Layer 3: contract (1, H) with (TB, H) along H -> (1, TB) lane-dense value row.
    # No zero-padded 128-wide output, no (TB, 128) intermediate, full-width store.
    v = jax.lax.dot_general(
        w3_ref[...], h2,
        dimension_numbers=(((1,), (1,)), ((), ())),
        preferred_element_type=jnp.float32,
    ) + b3_ref[...]               # b3 is (1, 1), broadcasts over (1, TB)

    o_ref[...] = v.reshape(o_ref.shape).astype(o_ref.dtype)


def ppo_critic_forward(state, params, *, tb=1024, matmul_dtype=jnp.float32):
    """state: (B, state_dim) f32. params: dict of w1,b1,w2,b2,w3,b3.

    matmul_dtype: jnp.bfloat16 is recommended for production on v5e/v6e/v7x (the
    state stream is the dominant HBM traffic and the MXU is bf16-native); biases,
    accumulation and ReLU stay f32 either way. The f32 default keeps the demo check
    exact against the pure-JAX reference."""
    B, state_dim = state.shape
    hidden = params["w1"].shape[1]

    # Matmul operands in matmul_dtype; biases stay f32.
    x = state.astype(matmul_dtype)
    w1 = params["w1"].astype(matmul_dtype)
    w2 = params["w2"].astype(matmul_dtype)
    w3r = params["w3"].reshape(1, hidden).astype(matmul_dtype)  # (H,1) -> (1,H) row
    b1, b2, b3 = params["b1"], params["b2"], params["b3"]        # f32

    # Tile selection: minimize batch padding; keep >=2 grid steps when there is
    # enough batch so the 'parallel' axis feeds both v7x TensorCores.
    n_tiles = pl.cdiv(B, max(8, tb))
    if B >= 16:
        n_tiles = max(n_tiles, 2)
    TB = _round_up(pl.cdiv(B, n_tiles), 8)
    n_tiles = pl.cdiv(B, TB)
    B_pad = n_tiles * TB
    if B_pad != B:
        x = jnp.pad(x, ((0, B_pad - B), (0, 0)))

    itemsize = jnp.dtype(matmul_dtype).itemsize
    flops = 2 * B_pad * hidden * (state_dim + hidden + 1)
    bytes_accessed = (
        B_pad * state_dim * itemsize                       # state rows (dominant stream)
        + (w1.size + w2.size + w3r.size) * itemsize        # VMEM-resident weights
        + (b1.size + b2.size + b3.size) * 4                # f32 biases
        + B_pad * 4                                        # lane-dense f32 values
    )

    const = lambda i: (0, 0)  # weights/biases: same block every step -> single DMA
    # TODO(synk): at hidden >= 1024 add pipeline_mode=pl.Buffered(1) on the
    # constant-index weight specs to halve resident-weight VMEM on v7x.

    out = pl.pallas_call(
        _critic_kernel,
        out_shape=jax.ShapeDtypeStruct((n_tiles, 1, TB), jnp.float32),
        grid=(n_tiles,),
        in_specs=[
            pl.BlockSpec((TB, state_dim), lambda i: (i, 0)),  # pipelined state tiles
            pl.BlockSpec(w1.shape, const),
            pl.BlockSpec(b1.shape, const),
            pl.BlockSpec(w2.shape, const),
            pl.BlockSpec(b2.shape, const),
            pl.BlockSpec(w3r.shape, const),
            pl.BlockSpec(b3.shape, const),
        ],
        out_specs=pl.BlockSpec((1, 1, TB), lambda i: (i, 0, 0)),
        compiler_params=pltpu.CompilerParams(
            dimension_semantics=("parallel",),      # megacore sharding on v7x
            vmem_limit_bytes=32 * 1024 * 1024,      # ample on v5e/v6e/v7x for this MLP
        ),
        cost_estimate=pl.CostEstimate(
            flops=flops, transcendentals=0, bytes_accessed=bytes_accessed),
    )(x, w1, b1, w2, b2, w3r, b3)

    # (n_tiles, 1, TB) row-major == (B_pad,) values; strip padding -> (B, 1).
    return out.reshape(B_pad, 1)[:B]


def init_params(key, state_dim, hidden_dim=256):
    """Deterministic init mimicking PyTorch nn.Linear (uniform +/- 1/sqrt(fan_in)).
    Weights stored as (in_features, out_features)."""
    def linear(k, fan_in, fan_out):
        kw, kb = jax.random.split(k)
        bound = 1.0 / np.sqrt(fan_in)
        w = jax.random.uniform(kw, (fan_in, fan_out), jnp.float32, -bound, bound)
        b = jax.random.uniform(kb, (1, fan_out), jnp.float32, -bound, bound)
        return w, b

    k1, k2, k3 = jax.random.split(key, 3)
    w1, b1 = linear(k1, state_dim, hidden_dim)
    w2, b2 = linear(k2, hidden_dim, hidden_dim)
    w3, b3 = linear(k3, hidden_dim, 1)
    return {"w1": w1, "b1": b1, "w2": w2, "b2": b2, "w3": w3, "b3": b3}


def _reference_forward(state, p):
    h1 = jnp.maximum(state @ p["w1"] + p["b1"], 0.0)
    h2 = jnp.maximum(h1 @ p["w2"] + p["b2"], 0.0)
    return h2 @ p["w3"] + p["b3"]


if __name__ == "__main__":
    key = jax.random.PRNGKey(0)
    k_params, k_state = jax.random.split(key)

    B, state_dim, hidden_dim = 2, 8, 32
    params = init_params(k_params, state_dim, hidden_dim)
    state = jax.random.normal(k_state, (B, state_dim), jnp.float32)

    # f32 end-to-end here so the check against the pure-JAX reference is tight;
    # pass matmul_dtype=jnp.bfloat16 for the memory-bound production path.
    value = ppo_critic_forward(state, params)
    value = jax.block_until_ready(value)

    ref = _reference_forward(state, params)
    np.testing.assert_allclose(np.asarray(value), np.asarray(ref), rtol=1e-5, atol=1e-5)
    assert value.shape == (B, 1)
    print("KERNEL_OK")
</pallas_src>

<mosaic_0001>
module attributes {stable_mosaic.version = 11 : i64} {
  func.func @_critic_kernel(%arg0: i32, %arg1: memref<8x8xf32, #tpu.memory_space<vmem>>, %arg2: memref<8x32xf32, #tpu.memory_space<vmem>>, %arg3: memref<1x32xf32, #tpu.memory_space<vmem>>, %arg4: memref<32x32xf32, #tpu.memory_space<vmem>>, %arg5: memref<1x32xf32, #tpu.memory_space<vmem>>, %arg6: memref<1x32xf32, #tpu.memory_space<vmem>>, %arg7: memref<1x1xf32, #tpu.memory_space<vmem>>, %arg8: memref<1x1x8xf32, #tpu.memory_space<vmem>>) attributes {dimension_semantics = [#tpu.dimension_semantics<parallel>], iteration_bounds = array<i64: 1>, scalar_prefetch = 0 : i64, scratch_operands = 0 : i64, tpu.core_type = #tpu.core_type<tc>, window_params = [{transform_indices = @transform_0, window_bounds = array<i64: 8, 8>}, {pipeline_mode = #tpu.pipeline_mode<synchronous>, transform_indices = @transform_1, window_bounds = array<i64: 8, 32>}, {pipeline_mode = #tpu.pipeline_mode<synchronous>, transform_indices = @transform_2, window_bounds = array<i64: 1, 32>}, {pipeline_mode = #tpu.pipeline_mode<synchronous>, transform_indices = @transform_3, window_bounds = array<i64: 32, 32>}, {pipeline_mode = #tpu.pipeline_mode<synchronous>, transform_indices = @transform_4, window_bounds = array<i64: 1, 32>}, {pipeline_mode = #tpu.pipeline_mode<synchronous>, transform_indices = @transform_5, window_bounds = array<i64: 1, 32>}, {pipeline_mode = #tpu.pipeline_mode<synchronous>, transform_indices = @transform_6, window_bounds = array<i64: 1, 1>}, {transform_indices = @transform_7, window_bounds = array<i64: 1, 1, 8>}]} {
    %c0 = arith.constant 0 : index
    %c0_0 = arith.constant 0 : index
    %0 = vector.load %arg1[%c0, %c0_0] : memref<8x8xf32, #tpu.memory_space<vmem>>, vector<8x8xf32>
    %c0_1 = arith.constant 0 : index
    %c0_2 = arith.constant 0 : index
    %1 = vector.load %arg2[%c0_1, %c0_2] : memref<8x32xf32, #tpu.memory_space<vmem>>, vector<8x32xf32>
    %cst = arith.constant dense<0.000000e+00> : vector<8x32xf32>
    %2 = tpu.matmul %0, %1, %cst {dimension_numbers = #tpu.dot_dimension_numbers<[1], [0], [0], [1], [0, 0, 1, 1], [], []>} : vector<8x8xf32>, vector<8x32xf32>, vector<8x32xf32> -> vector<8x32xf32>
    %c0_3 = arith.constant 0 : index
    %c0_4 = arith.constant 0 : index
    %3 = vector.load %arg3[%c0_3, %c0_4] : memref<1x32xf32, #tpu.memory_space<vmem>>, vector<1x32xf32>
    %4 = vector.broadcast %3 : vector<1x32xf32> to vector<8x32xf32>
    %5 = arith.addf %2, %4 : vector<8x32xf32>
    %cst_5 = arith.constant 0.000000e+00 : f32
    %6 = vector.broadcast %cst_5 : f32 to vector<8x32xf32>
    %7 = arith.maximumf %5, %6 : vector<8x32xf32>
    %c0_6 = arith.constant 0 : index
    %c0_7 = arith.constant 0 : index
    %8 = vector.load %arg4[%c0_6, %c0_7] : memref<32x32xf32, #tpu.memory_space<vmem>>, vector<32x32xf32>
    %cst_8 = arith.constant dense<0.000000e+00> : vector<8x32xf32>
    %9 = tpu.matmul %7, %8, %cst_8 {dimension_numbers = #tpu.dot_dimension_numbers<[1], [0], [0], [1], [0, 0, 1, 1], [], []>} : vector<8x32xf32>, vector<32x32xf32>, vector<8x32xf32> -> vector<8x32xf32>
    %c0_9 = arith.constant 0 : index
    %c0_10 = arith.constant 0 : index
    %10 = vector.load %arg5[%c0_9, %c0_10] : memref<1x32xf32, #tpu.memory_space<vmem>>, vector<1x32xf32>
    %11 = vector.broadcast %10 : vector<1x32xf32> to vector<8x32xf32>
    %12 = arith.addf %9, %11 : vector<8x32xf32>
    %cst_11 = arith.constant 0.000000e+00 : f32
    %13 = vector.broadcast %cst_11 : f32 to vector<8x32xf32>
    %14 = arith.maximumf %12, %13 : vector<8x32xf32>
    %c0_12 = arith.constant 0 : index
    %c0_13 = arith.constant 0 : index
    %15 = vector.load %arg6[%c0_12, %c0_13] : memref<1x32xf32, #tpu.memory_space<vmem>>, vector<1x32xf32>
    %cst_14 = arith.constant dense<0.000000e+00> : vector<1x8xf32>
    %16 = tpu.matmul %15, %14, %cst_14 {dimension_numbers = #tpu.dot_dimension_numbers<[1], [1], [0], [0], [0, 0, 1, 0], [], []>} : vector<1x32xf32>, vector<8x32xf32>, vector<1x8xf32> -> vector<1x8xf32>
    %c0_15 = arith.constant 0 : index
    %c0_16 = arith.constant 0 : index
    %17 = vector.load %arg7[%c0_15, %c0_16] : memref<1x1xf32, #tpu.memory_space<vmem>>, vector<1x1xf32>
    %18 = vector.broadcast %17 : vector<1x1xf32> to vector<1x8xf32>
    %19 = arith.addf %16, %18 : vector<1x8xf32>
    %20 = vector.shape_cast %19 : vector<1x8xf32> to vector<1x1x8xf32>
    %c0_17 = arith.constant 0 : index
    %c0_18 = arith.constant 0 : index
    %c0_19 = arith.constant 0 : index
    %21 = vector.load %arg8[%c0_17, %c0_18, %c0_19] : memref<1x1x8xf32, #tpu.memory_space<vmem>>, vector<1x1x8xf32>
    tpu.vector_store %arg8[%c0_17, %c0_18, %c0_19], %20 {strides = array<i32>} : memref<1x1x8xf32, #tpu.memory_space<vmem>>, vector<1x1x8xf32>,
    return
  }
  func.func @transform_0(%arg0: i32) -> (i32, i32) {
    %c0_i32 = arith.constant 0 : i32
    %c0_i32_0 = arith.constant 0 : i32
    return %arg0, %c0_i32 : i32, i32
  }
  func.func @transform_1(%arg0: i32) -> (i32, i32) {
    %c0_i32 = arith.constant 0 : i32
    %c0_i32_0 = arith.constant 0 : i32
    %c0_i32_1 = arith.constant 0 : i32
    return %c0_i32, %c0_i32_0 : i32, i32
  }
  func.func @transform_2(%arg0: i32) -> (i32, i32) {
    %c0_i32 = arith.constant 0 : i32
    %c0_i32_0 = arith.constant 0 : i32
    %c0_i32_1 = arith.constant 0 : i32
    return %c0_i32, %c0_i32_0 : i32, i32
  }
  func.func @transform_3(%arg0: i32) -> (i32, i32) {
    %c0_i32 = arith.constant 0 : i32
    %c0_i32_0 = arith.constant 0 : i32
    %c0_i32_1 = arith.constant 0 : i32
    return %c0_i32, %c0_i32_0 : i32, i32
  }
  func.func @transform_4(%arg0: i32) -> (i32, i32) {
    %c0_i32 = arith.constant 0 : i32
    %c0_i32_0 = arith.constant 0 : i32
    %c0_i32_1 = arith.constant 0 : i32
    return %c0_i32, %c0_i32_0 : i32, i32
  }
  func.func @transform_5(%arg0: i32) -> (i32, i32) {
    %c0_i32 = arith.constant 0 : i32
    %c0_i32_0 = arith.constant 0 : i32
    %c0_i32_1 = arith.constant 0 : i32
    return %c0_i32, %c0_i32_0 : i32, i32
  }
  func.func @transform_6(%arg0: i32) -> (i32, i32) {
    %c0_i32 = arith.constant 0 : i32
    %c0_i32_0 = arith.constant 0 : i32
    %c0_i32_1 = arith.constant 0 : i32
    return %c0_i32, %c0_i32_0 : i32, i32
  }
  func.func @transform_7(%arg0: i32) -> (i32, i32, i32) {
    %c0_i32 = arith.constant 0 : i32
    %c0_i32_0 = arith.constant 0 : i32
    %c0_i32_1 = arith.constant 0 : i32
    return %arg0, %c0_i32, %c0_i32_0 : i32, i32, i32
  }
}

</mosaic_0001>

<bundles_post_ra>
// kernel: tpu_custom_call.1
= control target key start
LH: loop header
LB: loop body
LE: loop exit
PB: predicated region body
PF: predicated region fallthrough
CT: control target
= control target key end

     0   :  { %s598_s0 = inlined_call_operand.hbm [shape: f32[8,8], index: 0, kind: input, shape index: {}]   ;;  %s599_s1 = inlined_call_operand.hbm [shape: f32[8,32], index: 1, kind: input, shape index: {}]   ;;  %s600_s2 = inlined_call_operand.vmem [shape: f32[1,32], index: 2, kind: input, shape index: {}]   ;;  %s601_s3 = inlined_call_operand.hbm [shape: f32[32,32], index: 3, kind: input, shape index: {}]   ;;  %s602_s4 = inlined_call_operand.vmem [shape: f32[1,32], index: 4, kind: input, shape index: {}]   ;;  %s603_s5 = inlined_call_operand.vmem [shape: f32[1,32], index: 5, kind: input, shape index: {}]   ;;  %s604_s6 = inlined_call_operand.<no memory space> [shape: f32[1,1], index: 6, kind: input, shape index: {}]   ;;  %s605_s7 = inlined_call_operand.hbm [shape: f32[1,1,8], index: 7, kind: output, shape index: {}]  }
   0x1   :  { %v12_v0 = vstv %s604_s6 }
   0x2   :  { %13 = vst [vmem:[#allocation2] sm:$0x1] %v12_v0 }
   0x3   :  { %14 = vsyncpa [#allocation4], 0 }
   0x4   :  { %15 = vsyncpa [#allocation7], 0 }
   0x5   :  { %16 = vsyncpa [#allocation5], 0  ;;  %s488_s26 = smov [#allocation6]   ;;  %s489_s28 = smov [#allocation3]  }
   0x6   :  { %s33_s27 = sshll.u32 %s488_s26, 4  ;;  %s23_s29 = sshll.u32 %s489_s28, 4  ;;  %s34_s27 = int_to_ptr.vmem [resolvable:$true] %s33_s27  ;;  %s24_s29 = int_to_ptr.vmem [resolvable:$true] %s23_s29 }
   0x7   :  { %s394_s9 = scalar_lea.hbm %s599_s1, 128 }
   0x8   :  { %p395_p0 = scmp.ne.s32.totalorder %s599_s1, %s394_s9  ;;  %p398_p1 = scmp.lt.u32.totalorder %s394_s9, %s599_s1 }
   0xa   :  { %p400_p2 = pnand %p398_p1, %p395_p0 }
   0xc   :  { %403 = shalt.err (!%p400_p2)
}
   0xd   :  { %s404_s13 = scalar_lea.vmem %s34_s27, 128  ;;  %p409_p4 = scmp.lt.s32.totalorder %s34_s27, %s34_s27 }
   0xe   :  { %p405_p3 = scmp.ne.s32.totalorder %s34_s27, %s404_s13  ;;  %p410_p5 = scmp.lt.s32.totalorder %s404_s13, %s404_s13 }
  0x10   :  { %p411_p6 = por %p410_p5, %p409_p4 }
  0x12   :  { %p412_p7 = pnand %p411_p6, %p405_p3 }
  0x14   :  { %415 = shalt.err (!%p412_p7)
}
  0x15   :  { %36 = dma.hbm_to_vmem [thread:$0]  %s599_s1, 128, %s34_s27, [#allocation7]  }
  0x16   :  { %s416_s18 = scalar_lea.hbm %s598_s0, 128 }
  0x17   :  { %p417_p8 = scmp.ne.s32.totalorder %s598_s0, %s416_s18  ;;  %p420_p9 = scmp.lt.u32.totalorder %s416_s18, %s598_s0 }
  0x19   :  { %p422_p10 = pnand %p420_p9, %p417_p8 }
  0x1b   :  { %425 = shalt.err (!%p422_p10)
}
  0x1c   :  { %s426_s23 = scalar_lea.vmem %s24_s29, 128  ;;  %p431_p12 = scmp.lt.s32.totalorder %s24_s29, %s24_s29 }
  0x1d   :  { %p427_p11 = scmp.ne.s32.totalorder %s24_s29, %s426_s23  ;;  %p432_p13 = scmp.lt.s32.totalorder %s426_s23, %s426_s23 }
  0x1f   :  { %p433_p0 = por %p432_p13, %p431_p12 }
  0x21   :  { %p434_p1 = pnand %p433_p0, %p427_p11 }
  0x23   :  { %437 = shalt.err (!%p434_p1)
}
  0x24   :  { %26 = dma.hbm_to_vmem [thread:$0]  %s598_s0, 128, %s24_s29, [#allocation4]  }
  0x25   :  { %s490_s25 = smov [#allocation8]   ;;  %s438_s30 = scalar_lea.hbm %s601_s3, 512 }
  0x26   :  { %s44_s26 = sshll.u32 %s490_s25, 4  ;;  %p439_p2 = scmp.ne.s32.totalorder %s601_s3, %s438_s30  ;;  %s45_s26 = int_to_ptr.vmem [resolvable:$true] %s44_s26 }
  0x27   :  { %p442_p3 = scmp.lt.u32.totalorder %s438_s30, %s601_s3 }
  0x29   :  { %p444_p4 = pnand %p442_p3, %p439_p2 }
  0x2b   :  { %447 = shalt.err (!%p444_p4)
}
  0x2c   :  { %s448_s12 = scalar_lea.vmem %s45_s26, 512  ;;  %p453_p6 = scmp.lt.s32.totalorder %s45_s26, %s45_s26 }
  0x2d   :  { %p449_p5 = scmp.ne.s32.totalorder %s45_s26, %s448_s12  ;;  %p454_p7 = scmp.lt.s32.totalorder %s448_s12, %s448_s12 }
  0x2f   :  { %p455_p8 = por %p454_p7, %p453_p6 }
  0x31   :  { %p456_p9 = pnand %p455_p8, %p449_p5 }
  0x33   :  { %459 = shalt.err (!%p456_p9)
}
  0x34   :  { %s491_s0 = smov 128   ;;  %s492_s29 = smov 8  }
  0x35   :  { %50 = dma.hbm_to_vmem [thread:$0]  %s601_s3, 512, %s45_s26, [#allocation7], %s491_s0, %s491_s0, %s492_s29  }
  0x36   :  { %482 = dma.done.wait [#allocation4], 128  }
  0x37   :  { %483 = vsyncadd [#allocation4], 4294967168 }
  0x38   :  { %484 = dma.done.wait [#allocation7], 640  }
  0x39   :  { %485 = vsyncadd [#allocation7], 4294966656  ;;  %v493_v1 = vmov 0.0   ;;  %vm494_vm0 = vmmov 0   ;;  %v495_v2 = vmov 0.0|0.0   ;;  %vm75_vm1 = vcmask 64512  }
  0x3a   :  { %356 = vmatprep.subr.mxu0 %v493_v1  ;;  %358 = vmatprep.mubr.msk.f32.mxu0 %vm494_vm0, %v493_v1  ;;  %v67_v3 = vld [vmem:[#allocation6] sm:$0xff]  ;;  %v66_v4 = vld [vmem:[#allocation3] sm:$0xff]  ;;  %v150_v5 = vld [vmem:[#allocation8] sm:$0xff]  ;;  %vm161_vm2 = vcmask 261120   ;;  %v496_v17 = vmov 0   ;;  %v243_v24 = vlaneseq  ;;  %s497_s18 = smov [#allocation9]  }
  0x3b   :  { %377 = vmatprep.subr.bf16.mxu1 %v495_v2  ;;  %369 = vmatprep.mubr.msk.f32.mxu1 %vm494_vm0, %v493_v1  ;;  %v151_v6 = vld [vmem:[#allocation8 + $0x8] sm:$0xff]  ;;  %v152_v8 = vld [vmem:[#allocation8 + $0x10] sm:$0xff]  ;;  %v153_v9 = vld [vmem:[#allocation8 + $0x18] sm:$0xff]  ;;  %s331_s19 = sshll.u32 %s497_s18, 4  ;;  %vm323_vm3 = vcmask 57344   ;;  %s332_s19 = int_to_ptr.vmem [resolvable:$true] %s331_s19 }
  0x3c   :  { %357 = vmatpush3.msra.mxu0 %v67_v3  ;;  %v378_v7 = vpack.c.bf16 %v151_v6, %v150_v5  ;;  %v381_v10 = vpack.c.bf16 %v153_v9, %v152_v8  ;;  %v341_v11 = vld [vmem:[%s600_s2] ss:$0 sm:$0xff]  ;;  %393 = vset.pattern.permute.xlu0 %v496_v17  ;;  %v244_v25 = vshrl.u32 %v243_v24, 7  ;;  %s464_s20 = scalar_lea.vmem %s332_s19, 32  ;;  %p465_p11 = scmp.lt.s32.totalorder %s332_s19, %s332_s19 }
  0x3d   :  { %359 = vmatmul.mubr.msk.f32.vlgmr.msra.gmra.mrb[0].mxu0 %vm75_vm1, %v66_v4  ;;  %372 = vmatprep.subr.mxu0 %v493_v1  ;;  %v237_v16 = vld [vmem:[#allocation2] sm:$0x1] }
  0x3e   :  { %374 = vmatprep.mubr.msk.f32.mxu0 %vm494_vm0, %v493_v1  ;;  %379 = vmatpush3.bf16.msra.mxu1 %v378_v7  ;;  %v343_v18 = vld [vmem:[%s602_s4] ss:$0 sm:$0xff]  ;;  %v245_v26 = vsub.s32 0, %v244_v25  ;;  %s460_s4 = scalar_lea.vmem %s332_s19, 16 }
  0x3f   :  { %380 = vmatprep.subr.bf16.mxu1 %v495_v2  ;;  %240 = vperm.xlu0 %393, %v237_v16   ;;  %v236_v23 = vld [vmem:[%s603_s5] sm:$0x1]  ;;  %p461_p10 = scmp.ne.s32.totalorder %s332_s19, %s460_s4  ;;  %p466_p12 = scmp.lt.s32.totalorder %s464_s20, %s460_s4 }
  0x41   :  { %p467_p13 = por %p466_p12, %p465_p11 }
  0x42   :  { %382 = vmatpush3.bf16.msra.mxu1 %v381_v10 }
  0x43   :  { %p468_p0 = pnand %p467_p13, %p461_p10 }
  0xbe   :  { %v241_v27 = vpop.permute.xlu0 %240 }
  0xbf   :  { %v246_v28 = vrot.slane %v241_v27, %v245_v26 }
 0x110   :  { %v145_v12 = vpop.f32.mrb[0].mxu0 }
 0x111   :  { %v146_v13 = vadd.f32 %v341_v11, %v145_v12  ;;  %v360_v14 = vpop.f32.mrb[1].mxu0 }
 0x113   :  { %v149_v15 = vmax.f32 %v146_v13, 0.0 }
 0x115   :  { %370 = vmatmul.mubr.msk.f32.vlgmr.msra.gmra.mrb[0].mxu1 %vm161_vm2, %v149_v15 }
 0x1e8   :  { %v231_v19 = vpop.f32.mrb[0].mxu1 }
 0x1e9   :  { %v232_v20 = vadd.f32 %v343_v18, %v231_v19  ;;  %v371_v21 = vpop.f32.mrb[1].mxu1 }
 0x1eb   :  { %v235_v22 = vmax.f32 %v232_v20, 0.0 }
 0x1ed   :  { %373 = vmatpush3.xpose.msk.msra.mxu0 %vm161_vm2, %v235_v22 }
 0x1f0   :  { %375 = vmatmul.mubr.msk.f32.vlgmr.msra.gmra.mrb[2].mxu0 %vm161_vm2, %v236_v23 }
 0x2c3   :  { %v319_v29 = vpop.f32.mrb[2].mxu0 }
 0x2c4   :  { %v320_v30 = vadd.f32 %v319_v29, %v246_v28  ;;  %v376_v31 = vpop.f32.mrb[3].mxu0 }
 0x2c6   :  { %324 = vst.msk [vmem:[#allocation9] sm:$0x1] %vm323_vm3, %v320_v30 }
 0x2c7   :  { %471 = shalt.err (!%p468_p0)
}
 0x2c8   :  { %s472_s22 = scalar_lea.hbm %s605_s7, 16 }
 0x2c9   :  { %p473_p1 = scmp.ne.s32.totalorder %s605_s7, %s472_s22  ;;  %p476_p2 = scmp.lt.u32.totalorder %s472_s22, %s605_s7 }
 0x2cb   :  { %p478_p3 = pnand %p476_p2, %p473_p1 }
 0x2cd   :  { %481 = shalt.err (!%p478_p3)
}
 0x2ce   :  { %334 = dma.vmem_to_hbm [thread:$0]  %s332_s19, 16, %s605_s7, [#allocation5]  }
 0x2cf   :  { %486 = dma.done.wait [#allocation5], 16  }
 0x2d0   :  { %487 = vsyncadd [#allocation5], 4294967280 }
 0x2d1   :  { %338 = vsyncpa [#allocation4], 1 }
 0x2d2   :  { %339 = vsyncpa [#allocation7], 1 }
 0x2d3   :  { %340 = vsyncpa [#allocation5], 1 }

</bundles_post_ra>
